<compile_context>
chip_gen: v6e
topology: v6e:2x2x1
jax: 0.10.0
libtpu: 0.0.40
codegen_flags: <defaults>
</compile_context>

<pallas_src>
import functools

import jax
import jax.numpy as jnp
from jax.experimental import pallas as pl
from jax.experimental.pallas import tpu as pltpu

EPS = 1e-5
_LANE = 128
_SUBLANE = 8


def _round_up(x, m):
    return (x + m - 1) // m * m


@functools.lru_cache(maxsize=1)
def _vmem_limit_bytes():
    # v5e/v6e: 128 MiB physical VMEM -> allow a generous scoped limit.
    # v7x: 64 MiB physical (32 MiB scoped default) -> stay comfortably below.
    try:
        cap = int(pltpu.get_tpu_info().vmem_capacity_bytes)
    except Exception:
        cap = 64 * 1024 * 1024
    return 96 * 1024 * 1024 if cap >= 128 * 1024 * 1024 else 48 * 1024 * 1024


def _pick_tiles(n, d, c_pad, x_itemsize, feat_itemsize, vmem_limit):
    """Tile sizes for both passes, budgeted against the scoped VMEM limit."""
    budget = int(vmem_limit * 0.8)

    # ---- Pass 1: only a double-buffered x tile + three (1, td) f32 rows. ----
    d_tiles = 2 if (d % 256 == 0 and d >= 256) else 1   # feed both TCs on v7x
    td = d // d_tiles
    per_row1 = 2 * td * x_itemsize                       # double-buffered x tile
    fixed1 = 5 * 4 * td                                   # k/s1/s2 scratch + scale/shift
    tn_stats = (max(budget - fixed1, 0) // max(per_row1, 1)) // _SUBLANE * _SUBLANE
    tn_stats = max(_SUBLANE, min(tn_stats, 4096, _round_up(n, _SUBLANE)))

    # ---- Pass 2: account for the DOUBLE-BUFFERED resident operands. ----
    wt_db = 2 * 2 * d * c_pad                             # bf16 W^T, 2 buffers
    if wt_db <= 8 * 1024 * 1024:
        tc = c_pad                                        # fully resident fast path
    else:
        tc = max(_LANE, (8 * 1024 * 1024 // (2 * 2 * d)) // _LANE * _LANE)
    resident = 2 * 2 * d * tc + 4 * 2 * d * 4             # W^T tile (x2) + scale/shift (x2)
    per_row2 = 2 * d * x_itemsize + 2 * d * feat_itemsize + 2 * tc * 4
    tn = (max(budget - resident, 0) // max(per_row2, 1)) // _SUBLANE * _SUBLANE
    tn = max(_SUBLANE, min(tn, 2048, _round_up(n, _SUBLANE)))
    return d_tiles, td, tn_stats, tn, tc


def _make_stats_kernel(n_rows, tile_rows):
    """Pass 1: masked, shifted sum / sumsq over batch tiles; emit folded scale/shift."""
    inv_n = 1.0 / float(n_rows)

    def kernel(x_ref, gamma_ref, beta_ref, scale_ref, shift_ref, k_ref, s1_ref, s2_ref):
        ni = pl.program_id(1)

        @pl.when(ni == 0)
        def _():
            # Per-feature shift (first batch row) -> numerically stable variance.
            k_ref[...] = x_ref[0:1, :].astype(jnp.float32)
            s1_ref[...] = jnp.zeros_like(s1_ref)
            s2_ref[...] = jnp.zeros_like(s2_ref)

        rows_left = n_rows - ni * tile_rows                       # mask the tail tile
        row_id = jax.lax.broadcasted_iota(jnp.int32, x_ref.shape, 0)
        xc = jnp.where(row_id < rows_left,
                       x_ref[...].astype(jnp.float32) - k_ref[...], 0.0)
        s1_ref[...] += jnp.sum(xc, axis=0, keepdims=True)
        s2_ref[...] += jnp.sum(xc * xc, axis=0, keepdims=True)

        @pl.when(ni == pl.num_programs(1) - 1)
        def _():
            m1 = s1_ref[...] * inv_n
            mean = k_ref[...] + m1
            var = s2_ref[...] * inv_n - m1 * m1                   # biased (training-mode) variance
            scale = jax.lax.rsqrt(var + EPS) * gamma_ref[...].astype(jnp.float32)
            scale_ref[...] = scale
            shift_ref[...] = beta_ref[...].astype(jnp.float32) - mean * scale

    return kernel


def _normalize_matmul_kernel(scale_ref, shift_ref, x_ref, wt_ref, feat_ref, score_ref):
    """Pass 2: feature = x*scale + shift; score = bf16 MXU matmul, f32 accumulation."""
    feature = x_ref[...].astype(jnp.float32) * scale_ref[...] + shift_ref[...]
    feat_ref[...] = feature.astype(feat_ref.dtype)
    score = jnp.dot(feature.astype(jnp.bfloat16), wt_ref[...],
                    preferred_element_type=jnp.float32)
    score_ref[...] = score.astype(score_ref.dtype)


def prepare_classifier_weight(weight):
    """Pre-transpose + lane-pad + bf16-cast the classifier weight ONCE (outside jit)."""
    c, d = weight.shape
    c_pad = _round_up(c, _LANE)
    return jnp.zeros((d, c_pad), jnp.bfloat16).at[:, :c].set(weight.T.astype(jnp.bfloat16))


@functools.partial(
    jax.jit,
    static_argnames=("class_num", "tile_n", "tile_n_stats", "tile_c", "feature_dtype"))
def bn_classifier_forward(x, gamma, beta, w_t, class_num,
                          tile_n=None, tile_n_stats=None, tile_c=None, feature_dtype=None):
    """x: (N, D); gamma, beta: (D,); w_t: prepared (D, C_pad) bf16 -> (feature, cls_score)."""
    n, d = x.shape
    d_w, c_pad = w_t.shape
    assert d_w == d and c_pad % _LANE == 0, "use prepare_classifier_weight()"
    feat_dtype = x.dtype if feature_dtype is None else jnp.dtype(feature_dtype)

    vmem_limit = _vmem_limit_bytes()
    d_tiles, td, tns_auto, tn_auto, tc_auto = _pick_tiles(
        n, d, c_pad, jnp.dtype(x.dtype).itemsize, jnp.dtype(feat_dtype).itemsize, vmem_limit)
    tn = tn_auto if tile_n is None else tile_n
    tn_stats = tns_auto if tile_n_stats is None else tile_n_stats
    tc = tc_auto if tile_c is None else tile_c

    stats_n_tiles = pl.cdiv(n, tn_stats)
    n_tiles = pl.cdiv(n, tn)
    c_tiles = pl.cdiv(c_pad, tc)

    gamma2 = gamma.astype(jnp.float32).reshape(1, d)
    beta2 = beta.astype(jnp.float32).reshape(1, d)

    # --- Pass 1: cross-tile batch statistics -> folded scale/shift (1, D). ---
    scale, shift = pl.pallas_call(
        _make_stats_kernel(n, tn_stats),
        out_shape=(
            jax.ShapeDtypeStruct((1, d), jnp.float32),
            jax.ShapeDtypeStruct((1, d), jnp.float32),
        ),
        grid_spec=pltpu.PrefetchScalarGridSpec(
            num_scalar_prefetch=0,
            grid=(d_tiles, stats_n_tiles),
            in_specs=[
                pl.BlockSpec((tn_stats, td), lambda di, ni: (ni, di)),  # x tile (streamed)
                pl.BlockSpec((1, td), lambda di, ni: (0, di)),          # gamma slice
                pl.BlockSpec((1, td), lambda di, ni: (0, di)),          # beta slice
            ],
            out_specs=[
                pl.BlockSpec((1, td), lambda di, ni: (0, di)),          # scale
                pl.BlockSpec((1, td), lambda di, ni: (0, di)),          # shift
            ],
            scratch_shapes=[pltpu.VMEM((1, td), jnp.float32)] * 3,      # k, sum, sumsq
        ),
        compiler_params=pltpu.CompilerParams(
            dimension_semantics=("parallel", "arbitrary"),
            vmem_limit_bytes=vmem_limit),
    )(x, gamma2, beta2)

    # --- Pass 2: normalize + classify; x/feature resident across the C axis. ---
    feature, score_p = pl.pallas_call(
        _normalize_matmul_kernel,
        out_shape=(
            jax.ShapeDtypeStruct((n, d), feat_dtype),
            jax.ShapeDtypeStruct((n, c_pad), x.dtype),
        ),
        grid_spec=pltpu.PrefetchScalarGridSpec(
            num_scalar_prefetch=0,
            grid=(n_tiles, c_tiles),
            in_specs=[
                pl.BlockSpec((1, d), lambda i, j: (0, 0)),      # scale (resident)
                pl.BlockSpec((1, d), lambda i, j: (0, 0)),      # shift (resident)
                pl.BlockSpec((tn, d), lambda i, j: (i, 0)),     # x tile (resident over C)
                pl.BlockSpec((d, tc), lambda i, j: (0, j)),     # W^T column tile (bf16)
            ],
            out_specs=[
                pl.BlockSpec((tn, d), lambda i, j: (i, 0)),     # feature (resident over C)
                pl.BlockSpec((tn, tc), lambda i, j: (i, j)),    # score (lane-dense)
            ],
        ),
        compiler_params=pltpu.CompilerParams(
            dimension_semantics=("parallel", "arbitrary"),
            vmem_limit_bytes=vmem_limit),
    )(scale, shift, x, w_t)

    cls_score = score_p if c_pad == class_num else score_p[:, :class_num]
    return feature, cls_score


def init_params(key, in_dim, class_num):
    # Matches BNClassifier._init_params:
    #   bn.weight = 1, bn.bias = 0, classifier.weight ~ Normal(0, 0.001), no bias.
    gamma = jnp.ones((in_dim,), jnp.float32)
    beta = jnp.zeros((in_dim,), jnp.float32)
    weight = 0.001 * jax.random.normal(key, (class_num, in_dim), jnp.float32)
    return gamma, beta, weight


if __name__ == "__main__":
    key = jax.random.PRNGKey(0)

    def reference(x, gamma, beta, weight):
        mu = jnp.mean(x, axis=0, keepdims=True)
        var = jnp.mean((x - mu) ** 2, axis=0, keepdims=True)
        feat = (x - mu) / jnp.sqrt(var + EPS) * gamma + beta
        return feat, feat @ weight.T

    # Small configs exercising: d-split stats grid, ragged batch tiles (tail masking),
    # non-lane-multiple D, C lane padding + column slice, and a C-tiled matmul.
    configs = [
        # (batch, in_dim, class_num, tile_n, tile_n_stats, tile_c)
        (37, 256, 48, 16, 8, None),
        (29, 96, 200, 8, 16, 128),
    ]

    for (batch, in_dim, class_num, tn, tns, tc) in configs:
        key, kx, kw = jax.random.split(key, 3)
        x = jax.random.normal(kx, (batch, in_dim), jnp.float32) * 1.7 + 0.5
        gamma, beta, weight = init_params(kw, in_dim, class_num)

        # W^T prepared once per weight, outside the jitted per-call path.
        w_t = prepare_classifier_weight(weight)

        feature, cls_score = bn_classifier_forward(
            x, gamma, beta, w_t, class_num, tile_n=tn, tile_n_stats=tns, tile_c=tc)
        jax.block_until_ready((feature, cls_score))

        feat_ref, score_ref = reference(x, gamma, beta, weight)
        assert feature.shape == (batch, in_dim) and cls_score.shape == (batch, class_num)
        assert jnp.allclose(feature, feat_ref, atol=2e-4, rtol=2e-4), \
            float(jnp.max(jnp.abs(feature - feat_ref)))
        # Score path feeds the MXU in bf16 (f32 accumulation) -> looser tolerance.
        assert jnp.allclose(cls_score, score_ref, atol=2e-3, rtol=5e-2), \
            float(jnp.max(jnp.abs(cls_score - score_ref)))

    print("KERNEL_OK")
</pallas_src>

<mosaic_0001>
module attributes {stable_mosaic.version = 11 : i64} {
  func.func @_normalize_matmul_kernel(%arg0: i32, %arg1: i32, %arg2: memref<1x256xf32, #tpu.memory_space<vmem>>, %arg3: memref<1x256xf32, #tpu.memory_space<vmem>>, %arg4: memref<16x256xf32, #tpu.memory_space<vmem>>, %arg5: memref<256x128xbf16, #tpu.memory_space<vmem>>, %arg6: memref<16x256xf32, #tpu.memory_space<vmem>>, %arg7: memref<16x128xf32, #tpu.memory_space<vmem>>) attributes {dimension_semantics = [#tpu.dimension_semantics<parallel>, #tpu.dimension_semantics<arbitrary>], iteration_bounds = array<i64: 3, 1>, scalar_prefetch = 0 : i64, scratch_operands = 0 : i64, tpu.core_type = #tpu.core_type<tc>, window_params = [{pipeline_mode = #tpu.pipeline_mode<synchronous>, transform_indices = @transform_0, window_bounds = array<i64: 1, 256>}, {pipeline_mode = #tpu.pipeline_mode<synchronous>, transform_indices = @transform_1, window_bounds = array<i64: 1, 256>}, {transform_indices = @transform_2, window_bounds = array<i64: 16, 256>}, {transform_indices = @transform_3, window_bounds = array<i64: 256, 128>}, {transform_indices = @transform_4, window_bounds = array<i64: 16, 256>}, {transform_indices = @transform_5, window_bounds = array<i64: 16, 128>}]} {
    %c0 = arith.constant 0 : index
    %c0_0 = arith.constant 0 : index
    %0 = vector.load %arg4[%c0, %c0_0] : memref<16x256xf32, #tpu.memory_space<vmem>>, vector<16x256xf32>
    %c0_1 = arith.constant 0 : index
    %c0_2 = arith.constant 0 : index
    %1 = vector.load %arg2[%c0_1, %c0_2] : memref<1x256xf32, #tpu.memory_space<vmem>>, vector<1x256xf32>
    %2 = vector.broadcast %1 : vector<1x256xf32> to vector<16x256xf32>
    %3 = arith.mulf %0, %2 : vector<16x256xf32>
    %c0_3 = arith.constant 0 : index
    %c0_4 = arith.constant 0 : index
    %4 = vector.load %arg3[%c0_3, %c0_4] : memref<1x256xf32, #tpu.memory_space<vmem>>, vector<1x256xf32>
    %5 = vector.broadcast %4 : vector<1x256xf32> to vector<16x256xf32>
    %6 = arith.addf %3, %5 : vector<16x256xf32>
    %c0_5 = arith.constant 0 : index
    %c0_6 = arith.constant 0 : index
    %7 = vector.load %arg6[%c0_5, %c0_6] : memref<16x256xf32, #tpu.memory_space<vmem>>, vector<16x256xf32>
    tpu.vector_store %arg6[%c0_5, %c0_6], %6 {strides = array<i32>} : memref<16x256xf32, #tpu.memory_space<vmem>>, vector<16x256xf32>,
    %8 = arith.truncf %6 : vector<16x256xf32> to vector<16x256xbf16>
    %c0_7 = arith.constant 0 : index
    %c0_8 = arith.constant 0 : index
    %9 = vector.load %arg5[%c0_7, %c0_8] : memref<256x128xbf16, #tpu.memory_space<vmem>>, vector<256x128xbf16>
    %cst = arith.constant dense<0.000000e+00> : vector<16x128xf32>
    %10 = tpu.matmul %8, %9, %cst {dimension_numbers = #tpu.dot_dimension_numbers<[1], [0], [0], [1], [0, 0, 1, 1], [], []>} : vector<16x256xbf16>, vector<256x128xbf16>, vector<16x128xf32> -> vector<16x128xf32>
    %c0_9 = arith.constant 0 : index
    %c0_10 = arith.constant 0 : index
    %11 = vector.load %arg7[%c0_9, %c0_10] : memref<16x128xf32, #tpu.memory_space<vmem>>, vector<16x128xf32>
    tpu.vector_store %arg7[%c0_9, %c0_10], %10 {strides = array<i32>} : memref<16x128xf32, #tpu.memory_space<vmem>>, vector<16x128xf32>,
    return
  }
  func.func @transform_0(%arg0: i32, %arg1: i32) -> (i32, i32) {
    %c0_i32 = arith.constant 0 : i32
    %c0_i32_0 = arith.constant 0 : i32
    %c0_i32_1 = arith.constant 0 : i32
    return %c0_i32, %c0_i32_0 : i32, i32
  }
  func.func @transform_1(%arg0: i32, %arg1: i32) -> (i32, i32) {
    %c0_i32 = arith.constant 0 : i32
    %c0_i32_0 = arith.constant 0 : i32
    %c0_i32_1 = arith.constant 0 : i32
    return %c0_i32, %c0_i32_0 : i32, i32
  }
  func.func @transform_2(%arg0: i32, %arg1: i32) -> (i32, i32) {
    %c0_i32 = arith.constant 0 : i32
    %c0_i32_0 = arith.constant 0 : i32
    return %arg0, %c0_i32 : i32, i32
  }
  func.func @transform_3(%arg0: i32, %arg1: i32) -> (i32, i32) {
    %c0_i32 = arith.constant 0 : i32
    %c0_i32_0 = arith.constant 0 : i32
    return %c0_i32, %arg1 : i32, i32
  }
  func.func @transform_4(%arg0: i32, %arg1: i32) -> (i32, i32) {
    %c0_i32 = arith.constant 0 : i32
    %c0_i32_0 = arith.constant 0 : i32
    return %arg0, %c0_i32 : i32, i32
  }
  func.func @transform_5(%arg0: i32, %arg1: i32) -> (i32, i32) {
    %c0_i32 = arith.constant 0 : i32
    return %arg0, %arg1 : i32, i32
  }
}

module attributes {stable_mosaic.version = 11 : i64} {
  func.func @kernel(%arg0: i32, %arg1: i32, %arg2: memref<8x128xf32, #tpu.memory_space<vmem>>, %arg3: memref<1x128xf32, #tpu.memory_space<vmem>>, %arg4: memref<1x128xf32, #tpu.memory_space<vmem>>, %arg5: memref<1x128xf32, #tpu.memory_space<vmem>>, %arg6: memref<1x128xf32, #tpu.memory_space<vmem>>, %arg7: memref<1x128xf32, #tpu.memory_space<vmem>>, %arg8: memref<1x128xf32, #tpu.memory_space<vmem>>, %arg9: memref<1x128xf32, #tpu.memory_space<vmem>>) attributes {dimension_semantics = [#tpu.dimension_semantics<parallel>, #tpu.dimension_semantics<arbitrary>], iteration_bounds = array<i64: 2, 5>, scalar_prefetch = 0 : i64, scratch_operands = 3 : i64, tpu.core_type = #tpu.core_type<tc>, window_params = [{transform_indices = @transform_0, window_bounds = array<i64: 8, 128>}, {transform_indices = @transform_1, window_bounds = array<i64: 1, 128>}, {transform_indices = @transform_2, window_bounds = array<i64: 1, 128>}, {transform_indices = @transform_3, window_bounds = array<i64: 1, 128>}, {transform_indices = @transform_4, window_bounds = array<i64: 1, 128>}]} {
    %c0_i32 = arith.constant 0 : i32
    %0 = arith.cmpi eq, %arg1, %c0_i32 : i32
    %1 = arith.extui %0 : i1 to i32
    %c0_i32_0 = arith.constant 0 : i32
    %2 = arith.cmpi ne, %1, %c0_i32_0 : i32
    scf.if %2 {
      %c0_15 = arith.constant 0 : index
      %c0_16 = arith.constant 0 : index
      %28 = vector.load %arg2[%c0_15, %c0_16] : memref<8x128xf32, #tpu.memory_space<vmem>>, vector<1x128xf32>
      %c0_17 = arith.constant 0 : index
      %c0_18 = arith.constant 0 : index
      %29 = vector.load %arg7[%c0_17, %c0_18] : memref<1x128xf32, #tpu.memory_space<vmem>>, vector<1x128xf32>
      tpu.vector_store %arg7[%c0_17, %c0_18], %28 {strides = array<i32>} : memref<1x128xf32, #tpu.memory_space<vmem>>, vector<1x128xf32>,
      %cst_19 = arith.constant 0.000000e+00 : f32
      %30 = vector.broadcast %cst_19 : f32 to vector<1x128xf32>
      %c0_20 = arith.constant 0 : index
      %c0_21 = arith.constant 0 : index
      %31 = vector.load %arg8[%c0_20, %c0_21] : memref<1x128xf32, #tpu.memory_space<vmem>>, vector<1x128xf32>
      tpu.vector_store %arg8[%c0_20, %c0_21], %30 {strides = array<i32>} : memref<1x128xf32, #tpu.memory_space<vmem>>, vector<1x128xf32>,
      %cst_22 = arith.constant 0.000000e+00 : f32
      %32 = vector.broadcast %cst_22 : f32 to vector<1x128xf32>
      %c0_23 = arith.constant 0 : index
      %c0_24 = arith.constant 0 : index
      %33 = vector.load %arg9[%c0_23, %c0_24] : memref<1x128xf32, #tpu.memory_space<vmem>>, vector<1x128xf32>
      tpu.vector_store %arg9[%c0_23, %c0_24], %32 {strides = array<i32>} : memref<1x128xf32, #tpu.memory_space<vmem>>, vector<1x128xf32>,
    } else {
    }
    %c8_i32 = arith.constant 8 : i32
    %3 = arith.muli %arg1, %c8_i32 : i32
    %c37_i32 = arith.constant 37 : i32
    %4 = arith.subi %c37_i32, %3 : i32
    %5 = tpu.iota {dimensions = array<i32: 0>} : vector<8x128xi32>
    %6 = vector.broadcast %4 : i32 to vector<8x128xi32>
    %7 = arith.cmpi slt, %5, %6 : vector<8x128xi32>
    %c0 = arith.constant 0 : index
    %c0_1 = arith.constant 0 : index
    %8 = vector.load %arg2[%c0, %c0_1] : memref<8x128xf32, #tpu.memory_space<vmem>>, vector<8x128xf32>
    %c0_2 = arith.constant 0 : index
    %c0_3 = arith.constant 0 : index
    %9 = vector.load %arg7[%c0_2, %c0_3] : memref<1x128xf32, #tpu.memory_space<vmem>>, vector<1x128xf32>
    %10 = vector.broadcast %9 : vector<1x128xf32> to vector<8x128xf32>
    %11 = arith.subf %8, %10 : vector<8x128xf32>
    %cst = arith.constant 0.000000e+00 : f32
    %12 = vector.broadcast %cst : f32 to vector<8x128xf32>
    %13 = arith.select %7, %11, %12 : vector<8x128xi1>, vector<8x128xf32>
    %c0_4 = arith.constant 0 : index
    %c0_5 = arith.constant 0 : index
    %14 = vector.load %arg8[%c0_4, %c0_5] : memref<1x128xf32, #tpu.memory_space<vmem>>, vector<1x128xf32>
    %cst_6 = arith.constant dense<0.000000e+00> : vector<128xf32>
    %15 = vector.multi_reduction <add>, %13, %cst_6 [0] : vector<8x128xf32> to vector<128xf32>
    %16 = vector.shape_cast %15 : vector<128xf32> to vector<1x128xf32>
    %17 = arith.addf %14, %16 : vector<1x128xf32>
    %c0_7 = arith.constant 0 : index
    %c0_8 = arith.constant 0 : index
    %18 = vector.load %arg8[%c0_7, %c0_8] : memref<1x128xf32, #tpu.memory_space<vmem>>, vector<1x128xf32>
    tpu.vector_store %arg8[%c0_7, %c0_8], %17 {strides = array<i32>} : memref<1x128xf32, #tpu.memory_space<vmem>>, vector<1x128xf32>,
    %c0_9 = arith.constant 0 : index
    %c0_10 = arith.constant 0 : index
    %19 = vector.load %arg9[%c0_9, %c0_10] : memref<1x128xf32, #tpu.memory_space<vmem>>, vector<1x128xf32>
    %20 = arith.mulf %13, %13 : vector<8x128xf32>
    %cst_11 = arith.constant dense<0.000000e+00> : vector<128xf32>
    %21 = vector.multi_reduction <add>, %20, %cst_11 [0] : vector<8x128xf32> to vector<128xf32>
    %22 = vector.shape_cast %21 : vector<128xf32> to vector<1x128xf32>
    %23 = arith.addf %19, %22 : vector<1x128xf32>
    %c0_12 = arith.constant 0 : index
    %c0_13 = arith.constant 0 : index
    %24 = vector.load %arg9[%c0_12, %c0_13] : memref<1x128xf32, #tpu.memory_space<vmem>>, vector<1x128xf32>
    tpu.vector_store %arg9[%c0_12, %c0_13], %23 {strides = array<i32>} : memref<1x128xf32, #tpu.memory_space<vmem>>, vector<1x128xf32>,
    %c4_i32 = arith.constant 4 : i32
    %25 = arith.cmpi eq, %arg1, %c4_i32 : i32
    %26 = arith.extui %25 : i1 to i32
    %c0_i32_14 = arith.constant 0 : i32
    %27 = arith.cmpi ne, %26, %c0_i32_14 : i32
    scf.if %27 {
      %c0_15 = arith.constant 0 : index
      %c0_16 = arith.constant 0 : index
      %28 = vector.load %arg8[%c0_15, %c0_16] : memref<1x128xf32, #tpu.memory_space<vmem>>, vector<1x128xf32>
      %cst_17 = arith.constant 0.0270270277 : f32
      %29 = vector.broadcast %cst_17 : f32 to vector<1x128xf32>
      %30 = arith.mulf %28, %29 : vector<1x128xf32>
      %c0_18 = arith.constant 0 : index
      %c0_19 = arith.constant 0 : index
      %31 = vector.load %arg7[%c0_18, %c0_19] : memref<1x128xf32, #tpu.memory_space<vmem>>, vector<1x128xf32>
      %32 = arith.addf %31, %30 : vector<1x128xf32>
      %c0_20 = arith.constant 0 : index
      %c0_21 = arith.constant 0 : index
      %33 = vector.load %arg9[%c0_20, %c0_21] : memref<1x128xf32, #tpu.memory_space<vmem>>, vector<1x128xf32>
      %cst_22 = arith.constant 0.0270270277 : f32
      %34 = vector.broadcast %cst_22 : f32 to vector<1x128xf32>
      %35 = arith.mulf %33, %34 : vector<1x128xf32>
      %36 = arith.mulf %30, %30 : vector<1x128xf32>
      %37 = arith.subf %35, %36 : vector<1x128xf32>
      %cst_23 = arith.constant 9.99999974E-6 : f32
      %38 = vector.broadcast %cst_23 : f32 to vector<1x128xf32>
      %39 = arith.addf %37, %38 : vector<1x128xf32>
      %40 = math.rsqrt %39 : vector<1x128xf32>
      %c0_24 = arith.constant 0 : index
      %c0_25 = arith.constant 0 : index
      %41 = vector.load %arg3[%c0_24, %c0_25] : memref<1x128xf32, #tpu.memory_space<vmem>>, vector<1x128xf32>
      %42 = arith.mulf %40, %41 : vector<1x128xf32>
      %c0_26 = arith.constant 0 : index
      %c0_27 = arith.constant 0 : index
      %43 = vector.load %arg5[%c0_26, %c0_27] : memref<1x128xf32, #tpu.memory_space<vmem>>, vector<1x128xf32>
      tpu.vector_store %arg5[%c0_26, %c0_27], %42 {strides = array<i32>} : memref<1x128xf32, #tpu.memory_space<vmem>>, vector<1x128xf32>,
      %c0_28 = arith.constant 0 : index
      %c0_29 = arith.constant 0 : index
      %44 = vector.load %arg4[%c0_28, %c0_29] : memref<1x128xf32, #tpu.memory_space<vmem>>, vector<1x128xf32>
      %45 = arith.mulf %32, %42 : vector<1x128xf32>
      %46 = arith.subf %44, %45 : vector<1x128xf32>
      %c0_30 = arith.constant 0 : index
      %c0_31 = arith.constant 0 : index
      %47 = vector.load %arg6[%c0_30, %c0_31] : memref<1x128xf32, #tpu.memory_space<vmem>>, vector<1x128xf32>
      tpu.vector_store %arg6[%c0_30, %c0_31], %46 {strides = array<i32>} : memref<1x128xf32, #tpu.memory_space<vmem>>, vector<1x128xf32>,
    } else {
    }
    return
  }
  func.func @transform_0(%arg0: i32, %arg1: i32) -> (i32, i32) {
    %c0_i32 = arith.constant 0 : i32
    return %arg1, %arg0 : i32, i32
  }
  func.func @transform_1(%arg0: i32, %arg1: i32) -> (i32, i32) {
    %c0_i32 = arith.constant 0 : i32
    %c0_i32_0 = arith.constant 0 : i32
    return %c0_i32, %arg0 : i32, i32
  }
  func.func @transform_2(%arg0: i32, %arg1: i32) -> (i32, i32) {
    %c0_i32 = arith.constant 0 : i32
    %c0_i32_0 = arith.constant 0 : i32
    return %c0_i32, %arg0 : i32, i32
  }
  func.func @transform_3(%arg0: i32, %arg1: i32) -> (i32, i32) {
    %c0_i32 = arith.constant 0 : i32
    %c0_i32_0 = arith.constant 0 : i32
    return %c0_i32, %arg0 : i32, i32
  }
  func.func @transform_4(%arg0: i32, %arg1: i32) -> (i32, i32) {
    %c0_i32 = arith.constant 0 : i32
    %c0_i32_0 = arith.constant 0 : i32
    return %c0_i32, %arg0 : i32, i32
  }
}

</mosaic_0001>

<bundles_post_ra>
// kernel: bn_classifier_forward.3
= control target key start
LH: loop header
LB: loop body
LE: loop exit
PB: predicated region body
PF: predicated region fallthrough
CT: control target
= control target key end

     0   :  { %11 = vsyncpa [#allocation3], 0  ;;  %s1249_s0 = inlined_call_operand.vmem [shape: f32[1,256], index: 0, kind: input, shape index: {}]   ;;  %s1250_s1 = inlined_call_operand.vmem [shape: f32[1,256], index: 1, kind: input, shape index: {}]   ;;  %s1251_s2 = inlined_call_operand.vmem [shape: f32[37,256], index: 2, kind: input, shape index: {}]   ;;  %s1252_s3 = inlined_call_operand.hbm [shape: bf16[256,128], index: 3, kind: input, shape index: {}]   ;;  %s1253_s4 = inlined_call_operand.hbm [shape: f32[37,256], index: 4, kind: output, shape index: {0}]   ;;  %s1254_s5 = inlined_call_operand.hbm [shape: f32[37,128], index: 5, kind: output, shape index: {1}]  }
   0x1   :  { %12 = vsyncpa [#allocation4], 0 }
   0x2   :  { %14 = vsyncpa [#allocation4 + $0x1], 0 }
   0x3   :  { %15 = vsyncpa [#allocation7], 0 }
   0x4   :  { %17 = vsyncpa [#allocation7 + $0x1], 0  ;;  %s1034_s18 = smov 0   ;;  %s1036_s19 = smov 0  }
   0x5   :  { %s1038_s20 = smov 0   ;;  %s1040_s21 = smov 0  }
   0x6   :  { %s1042_s22 = smov 0   ;;  %s1044_s23 = smov 0  }
   0x7 LB: > { %s693_s24 = sadd.s32 4294967295, %s993_s23   ;;  %s694_s25 = sadd.s32 4294967294, %s993_s23   ;;  %s993_s23 = sphi %s1044_s23, %s23_s23   ;;  %s989_s22 = sphi %s1042_s22, %s1265_s22   ;;  %s985_s21 = sphi %s1040_s21, %s1264_s21   ;;  %s981_s20 = sphi %s1038_s20, %s1263_s20   ;;  %s977_s19 = sphi %s1036_s19, %s1262_s19   ;;  %s973_s18 = sphi %s1034_s18, %s1261_s18  }
   0x8   : > { %s35_s26 = sadd.s32 1, %s989_s22  ;;  %s136_s27 = sadd.s32 1, %s981_s20 }
   0x9   : > { %p37_p0 = scmp.ge.s32.totalorder %s35_s26, 3  ;;  %p146_p1 = scmp.ne.s32.totalorder %s981_s20, %s977_s19 }
   0xa   : > { %p147_p2 = scmp.eq.s32.totalorder %s693_s24, 2  ;;  %p152_p3 = scmp.ne.s32.totalorder %s977_s19, %s973_s18 }
   0xb   : > { %s1267_s26 = smov (%p37_p0, %s35_s26), 0  ;;  %p153_p5 = scmp.eq.s32.totalorder %s694_s25, 2 }
   0xc   : > { %p1074_p4 = por %p147_p2, %p146_p1  ;;  %s133_s29 = ssub.s32 %s989_s22, %s1267_s26 }
   0xd   : > { %p695_p6 = scmp.ge.s32.totalorder %s993_s23, 1  ;;  %p134_p7 = scmp.eq.s32.totalorder %s133_s29, 0 }
   0xe   : > { %p1081_p8 = por %p153_p5, %p152_p3  ;;  %p188_p9 = scmp.lt.s32.totalorder %s993_s23, 4 }
   0xf   : > { %s1087_s6 = scalar_select %p134_p7, %s981_s20, %s136_s27  }
  0x10   : > { %p1089_p10 = pnand %p695_p6, %p188_p9  ;;  %p1093_p11 = scmp.eq.s32.totalorder %s693_s24, 0 }
  0x11   : > { %s995_s9 = smov [#allocation2]  }
  0x12   : > { %p772_p12 = pneg %p1089_p10  ;;  %s208_s10 = sshll.u32 %s995_s9, 4  ;;  %s209_s10 = int_to_ptr.vmem [resolvable:$true] %s208_s10 }
  0x13   : > { %s868_s11 = scalar_lea.vmem %s209_s10, 2048  ;;  %p876_p5 = scmp.lt.s32.totalorder %s209_s10, %s209_s10 }
  0x14   : > { %p773_p13 = pnand %p1093_p11, %p772_p12  ;;  %p869_p1 = scmp.ne.s32.totalorder %s209_s10, %s868_s11 }
  0x15   : > { %p877_p6 = scmp.lt.s32.totalorder %s868_s11, %s868_s11 }
  0x16   : > { %p859_p0 = pneg %p773_p13 }
  0x17   : > { %p878_p7 = por %p877_p6, %p876_p5 }
  0x18   : > { %p871_p2 = pnand %p869_p1, %p859_p0 }
  0x1a   : > { %p872_p3 = pneg %p871_p2 }
  0x1c   : > { %p879_p9 = pnand %p878_p7, %p872_p3 }
  0x1e   : > { %882 = shalt.err (!%p879_p9)
}
  0x1f   : > { %s996_s12 = smov 64   ;;  %s997_s13 = smov 4  }
  0x20   : > { %775 = dma.hbm_to_vmem [thread:$0]  (!%p773_p13), %s1252_s3, 2048, %s209_s10, [#allocation3], %s996_s12, %s996_s12, %s997_s13  }
  0x21   : > { %244 = sbr.rel (%p1089_p10) target bundleno = 334 (0x14e), region = 36 }
  0x26   : > { %960 = dma.done.wait (%p1093_p11), [#allocation3], 2048  }
  0x27   : > { %962 = vsyncadd (%p1093_p11), [#allocation3], 4294965248  ;;  %s1111_s16 = sand.u32 1, %s977_s19   ;;  %s1114_s17 = sshll.u32 %s985_s21, 1  ;;  %v841_v0 = vld [vmem:[#allocation2 + $0x78] sm:$0xff]   ;;  %v843_v2 = vld [vmem:[#allocation2 + $0x70] sm:$0xff]   ;;  %v318_v5 = vlaneseq }
  0x28   : > { %v842_v1 = vld [vmem:[#allocation2 + $0x38] sm:$0xff]   ;;  %744 = vmatprep.subr.bf16.mxu0 %v841_v0  ;;  %p289_p12 = scmp.lt.s32.totalorder %s1114_s17, 4  ;;  %v844_v3 = vld [vmem:[#allocation2 + $0x30] sm:$0xff]   ;;  %v845_v4 = vld [vmem:[#allocation2 + $0x68] sm:$0xff]   ;;  %s700_s10 = sshll.u32 %s1111_s16, 5 }
  0x29   : > { %745 = vmatpush3.bf16.msra.mxu0 %v842_v1  ;;  %v846_v6 = vld [vmem:[#allocation2 + $0x28] sm:$0xff]   ;;  %v847_v7 = vld [vmem:[#allocation2 + $0x60] sm:$0xff]   ;;  %v319_v8 = vshrl.u32 %v318_v5, 7  ;;  %v849_v10 = vld [vmem:[#allocation2 + $0x58] sm:$0xff]   ;;  %s1128_s13 = scalar_lea.vmem [#allocation5], %s700_s10  ;;  %s701_s14 = sshll.u32 %s1111_s16, 4 }
  0x2a   : > { %746 = vmatprep.subr.bf16.mxu0 %v843_v2  ;;  %s290_s24 = scalar_select %p289_p12, %s1114_s17, 4  ;;  %v848_v9 = vld [vmem:[#allocation2 + $0x20] sm:$0xff]   ;;  %v850_v13 = vld [vmem:[#allocation2 + $0x18] sm:$0xff]   ;;  %v851_v14 = vld [vmem:[#allocation2 + $0x50] sm:$0xff]  }
  0x2b   : > { %v320_v11 = vsub.s32 0, %v319_v8  ;;  %v324_v12 = vsub.s32 1, %v319_v8  ;;  %v316_v17 = vld [vmem:[%s1249_s0] sm:$0x3]  ;;  %v852_v25 = vld [vmem:[#allocation2 + $0x10] sm:$0xff]   ;;  %v853_v30 = vld [vmem:[#allocation2 + $0x48] sm:$0xff]  }
  0x2c   : > { %s739_s25 = sshll.u32 %s290_s24, 4  ;;  %v332_v20 = vld [vmem:[%s1250_s1] sm:$0x3]  ;;  %v854_v35 = vld [vmem:[#allocation2 + $0x8] sm:$0xff]   ;;  %s1135_s15 = scalar_lea.vmem [#allocation6], %s701_s14 }
  0x2d   : > { %747 = vmatpush3.bf16.msra.mxu0 %v844_v3  ;;  %s293_s7 = scalar_lea.vmem %s1251_s2, %s739_s25  ;;  %v321_v18 = vrot.slane %v316_v17, %v320_v11  ;;  %v325_v19 = vrot.slane %v316_v17, %v324_v12  ;;  %v337_v23 = vrot.slane %v332_v20, %v320_v11  ;;  %v341_v24 = vrot.slane %v332_v20, %v324_v12  ;;  %v855_v37 = vld [vmem:[#allocation2 + $0x40] sm:$0xff]   ;;  %s526_s24 = scalar_lea.sflag [#allocation4], %s1111_s16 }
  0x2e   : > { %748 = vmatprep.subr.bf16.mxu0 %v845_v4  ;;  %v313_v15 = vld [vmem:[%s293_s7 + $0x8] sm:$0xff]  ;;  %v315_v16 = vld [vmem:[%s293_s7 + $0x18] sm:$0xff]  ;;  %v312_v21 = vld [vmem:[%s293_s7] sm:$0xff]  ;;  %s539_s27 = ssub.s32 (%p1074_p4), 5, %s1114_s17 }
  0x2f   : > { %v314_v22 = vld [vmem:[%s293_s7 + $0x10] sm:$0xff]  ;;  %v329_v26 = vmul.f32 %v325_v19, %v313_v15  ;;  %v331_v27 = vmul.f32 %v325_v19, %v315_v16  ;;  %v328_v28 = vmul.f32 %v321_v18, %v312_v21  ;;  %v856_v38 = vld [vmem:[#allocation2] sm:$0xff]   ;;  %p540_p10 = scmp.lt.s32.totalorder (%p1074_p4), %s539_s27, 2 }
  0x30   : > { %v330_v29 = vmul.f32 %v321_v18, %v314_v22 }
  0x31   : > { %749 = vmatpush3.bf16.msra.mxu0 %v846_v6  ;;  %v345_v31 = vadd.f32 %v341_v24, %v329_v26  ;;  %v347_v32 = vadd.f32 %v341_v24, %v331_v27  ;;  %v344_v33 = vadd.f32 %v337_v23, %v328_v28 }
  0x32   : > { %750 = vmatprep.subr.bf16.mxu0 %v847_v7  ;;  %v346_v34 = vadd.f32 %v337_v23, %v330_v29 }
  0x33   : > { %349 = vst [vmem:[%s1128_s13 + $0x8] sm:$0xff] %v345_v31  ;;  %351 = vst [vmem:[%s1128_s13 + $0x18] sm:$0xff] %v347_v32  ;;  %v353_v36 = vpack.c.bf16 %v347_v32, %v345_v31 }
  0x34   : > { %348 = vst [vmem:[%s1128_s13] sm:$0xff] %v344_v33  ;;  %350 = vst [vmem:[%s1128_s13 + $0x10] sm:$0xff] %v346_v34  ;;  %v352_v39 = vpack.c.bf16 %v346_v34, %v344_v33 }
  0x35   : > { %751 = vmatpush3.bf16.msra.mxu0 %v848_v9  ;;  %514 = vmatprep.mubr.bf16.mxu0 %v353_v36 }
  0x36   : > { %752 = vmatprep.subr.bf16.mxu0 %v849_v10 }
  0x39   : > { %753 = vmatpush3.bf16.msra.mxu0 %v850_v13 }
  0x3a   : > { %754 = vmatprep.subr.bf16.mxu0 %v851_v14 }
  0x3d   : > { %755 = vmatpush3.bf16.msra.mxu0 %v852_v25 }
  0x3e   : > { %756 = vmatprep.subr.bf16.mxu0 %v853_v30 }
  0x41   : > { %757 = vmatpush3.bf16.msra.mxu0 %v854_v35 }
  0x42   : > { %758 = vmatprep.subr.bf16.mxu0 %v855_v37 }
  0x45   : > { %759 = vmatpush3.bf16.msra.mxu0 %v856_v38 }
  0x48   : > { %515 = vmatmul.mubr.bf16.vlgmr.msra.gmra.mxu0 %v352_v39 }
 0x108   : > { %v760_v40 = vpop.f32.mrf.mxu0 }
 0x10a   : > { %v761_v41 = vpop.f32.mrf.mxu0 }
 0x10b   : > { %v762_v42 = vadd.f32 %v761_v41, %v760_v40 }
 0x10c   : > { %v763_v43 = vpop.f32.mrf.mxu0 }
 0x10d   : > { %523 = vst [vmem:[%s1135_s15] sm:$0xff] %v762_v42  ;;  %537 = sbr.rel (!%p1074_p4) target bundleno = 301 (0x12d), region = 44 }
 0x10e   : > { %v764_v44 = vpop.f32.mrf.mxu0 }
 0x10f   : > { %v765_v45 = vadd.f32 %v764_v44, %v763_v43 }
 0x111   : > { %524 = vst [vmem:[%s1135_s15 + $0x8] sm:$0xff] %v765_v45 }
 0x112   : > { %s1269_s27 = smov (!%p540_p10, %s539_s27), 2 }
 0x113   : > { %s1144_s29 = sshll.u32 %s1269_s27, 8 }
 0x114   : > { %s545_s7 = ssub.s32 512, %s1144_s29 }
 0x115   : > { %546 = vsyncadd %s526_s24, %s545_s7  ;;  %p726_p11 = scmp.ne.s32.totalorder %s1144_s29, 0  ;;  %s742_s8 = sshll.u32 %s985_s21, 9 }
 0x116   : > { %s1154_s11 = scalar_lea.hbm %s1253_s4, %s742_s8  ;;  %s552_s12 = sshll.u32 %s1128_s13, 4  ;;  %s1157_s12 = int_to_ptr.vmem [resolvable:$true] %s552_s12 }
 0x117   : > { %s883_s14 = scalar_lea.vmem %s1157_s12, %s1144_s29  ;;  %s998_s27 = smov [#allocation5]  }
 0x118   : > { %p884_p13 = scmp.ne.s32.totalorder %s1157_s12, %s883_s14  ;;  %s887_s7 = sshll.u32 %s998_s27, 4  ;;  %s888_s7 = int_to_ptr.vmem [resolvable:$false] %s887_s7 }
 0x119   : > { %s889_s25 = scalar_lea.vmem %s888_s7, 1024  ;;  %p890_p2 = scmp.lt.s32.totalorder %s1157_s12, %s888_s7 }
 0x11a   : > { %p885_p0 = pnand %p884_p13, %p726_p11  ;;  %p891_p3 = scmp.lt.s32.totalorder %s889_s25, %s883_s14 }
 0x11c   : > { %p886_p1 = pneg %p885_p0  ;;  %p892_p5 = por %p891_p3, %p890_p2 }
 0x11e   : > { %p893_p6 = pnand %p892_p5, %p886_p1 }
 0x120   : > { %896 = shalt.err (!%p893_p6)
}
 0x121   : > { %s897_s13 = scalar_lea.hbm %s1154_s11, %s1144_s29  ;;  %s901_s10 = scalar_lea.hbm %s1253_s4, 1280 }
 0x122   : > { %p898_p7 = scmp.ne.s32.totalorder %s1154_s11, %s897_s13  ;;  %p902_p10 = scmp.lt.s32.totalorder %s1154_s11, %s1253_s4 }
 0x123   : > { %p903_p13 = scmp.lt.s32.totalorder %s901_s10, %s897_s13 }
 0x124   : > { %p899_p9 = pnand %p898_p7, %p726_p11 }
 0x125   : > { %p904_p0 = por %p903_p13, %p902_p10 }
 0x126   : > { %p900_p12 = pneg %p899_p9 }
 0x128   : > { %p905_p1 = pnand %p904_p0, %p900_p12 }
 0x12a   : > { %908 = shalt.err (!%p905_p1)
}
 0x12b   : > { %s999_s25 = smov 256   ;;  %s1000_s14 = smov 16  }
 0x12c   : > { %558 = dma.vmem_to_hbm [thread:$0]  (%p726_p11), %s1157_s12, %s1144_s29, %s1154_s11, %s526_s24, %s999_s25, %s999_s25, %s1000_s14  }
 0x12d PF: > { %561 = sbr.rel (!%p1074_p4) target bundleno = 334 (0x14e), region = 48  ;;  %s563_s13 = ssub.s32 (%p1074_p4), 5, %s1114_s17 }
 0x12e   : > { %p564_p2 = scmp.lt.s32.totalorder (%p1074_p4), %s563_s13, 2  ;;  %s1259_s10 = scalar_lea.sflag (%p1074_p4), [#allocation7], %s1111_s16 }
 0x132   : > { %s1271_s13 = smov (!%p564_p2, %s563_s13), 2 }
 0x133   : > { %s1187_s8 = sshll.u32 %s1271_s13, 7 }
 0x134   : > { %s568_s9 = ssub.s32 256, %s1187_s8 }
 0x135   : > { %569 = vsyncadd %s1259_s10, %s568_s9  ;;  %p733_p11 = scmp.ne.s32.totalorder %s1187_s8, 0  ;;  %s743_s24 = sshll.u32 %s985_s21, 8 }
 0x136   : > { %s1197_s11 = scalar_lea.hbm %s1254_s5, %s743_s24  ;;  %s575_s17 = sshll.u32 %s1135_s15, 4  ;;  %s1200_s17 = int_to_ptr.vmem [resolvable:$true] %s575_s17 }
 0x137   : > { %s909_s12 = scalar_lea.vmem %s1200_s17, %s1187_s8  ;;  %s1001_s27 = smov [#allocation6]  }
 0x138   : > { %p910_p4 = scmp.ne.s32.totalorder %s1200_s17, %s909_s12  ;;  %s913_s7 = sshll.u32 %s1001_s27, 4  ;;  %s914_s7 = int_to_ptr.vmem [resolvable:$false] %s913_s7 }
 0x139   : > { %s915_s21 = scalar_lea.vmem %s914_s7, 512  ;;  %p916_p6 = scmp.lt.s32.totalorder %s1200_s17, %s914_s7 }
 0x13a   : > { %p911_p3 = pnand %p910_p4, %p733_p11  ;;  %p917_p7 = scmp.lt.s32.totalorder %s915_s21, %s909_s12 }
 0x13c   : > { %p912_p5 = pneg %p911_p3  ;;  %p918_p9 = por %p917_p7, %p916_p6 }
 0x13e   : > { %p919_p12 = pnand %p918_p9, %p912_p5 }
 0x140   : > { %922 = shalt.err (!%p919_p12)
}
 0x141   : > { %s923_s15 = scalar_lea.hbm %s1197_s11, %s1187_s8  ;;  %s927_s13 = scalar_lea.hbm %s1254_s5, 640 }
 0x142   : > { %p924_p10 = scmp.ne.s32.totalorder %s1197_s11, %s923_s15  ;;  %p928_p1 = scmp.lt.s32.totalorder %s1197_s11, %s1254_s5 }
 0x143   : > { %p929_p2 = scmp.lt.s32.totalorder %s927_s13, %s923_s15 }
 0x144   : > { %p925_p13 = pnand %p924_p10, %p733_p11 }
 0x145   : > { %p930_p4 = por %p929_p2, %p928_p1 }
 0x146   : > { %p926_p0 = pneg %p925_p13 }
 0x148   : > { %p931_p3 = pnand %p930_p4, %p926_p0 }
 0x14a   : > { %934 = shalt.err (!%p931_p3)
}
 0x14b   : > { %s1002_s24 = smov 128   ;;  %s1003_s28 = smov 8  }
 0x14c   : > { %s1260_s29 = scalar_lea.sflag [#allocation7], %s1111_s16 }
 0x14d   : > { %581 = dma.vmem_to_hbm [thread:$0]  (%p733_p11), %s1200_s17, %s1187_s8, %s1197_s11, %s1260_s29, %s1002_s24, %s1002_s24, %s1003_s28  }
 0x14e PF: > { %p785_p5 = scmp.ge.s32.totalorder %s993_s23, 2  ;;  %s590_s12 = sand.u32 1, %s973_s18  }
 0x14f   : > { %s591_s27 = scalar_lea.sflag [#allocation4], %s590_s12 }
 0x150   : > { %p777_p6 = pnand %p785_p5, %p1081_p8 }
 0x152   : > { %p778_p7 = pneg %p777_p6 }
 0x154   : > { %964 = dma.done.wait (%p778_p7), %s591_s27, 512  }
 0x155   : > { %966 = vsyncadd (%p778_p7), %s591_s27, 4294966784  ;;  %s600_s7 = scalar_lea.sflag [#allocation7], %s590_s12 }
 0x156   : > { %968 = dma.done.wait (%p778_p7), %s600_s7, 256  }
 0x157   : > { %970 = vsyncadd (%p778_p7), %s600_s7, 4294967040  ;;  %s23_s23 = sadd.s32 1, %s993_s23   ;;  %s1261_s18 = smov %s977_s19 }
 0x158   : > { %p20_p9 = scmp.ge.s32.totalorder %s23_s23, 5   ;;  %s1262_s19 = smov %s981_s20 }
 0x159   : > { %s1263_s20 = smov %s1087_s6  ;;  %s1264_s21 = smov %s989_s22 }
 0x15a   : > { %s1265_s22 = smov %s1267_s26  ;;  %22 = sbr.rel (!%p20_p9) target bundleno = 7 (0x7), region = 94 }
 0x15f   :  { %605 = vsyncpa [#allocation3], 1 }
 0x160   :  { %607 = vsyncpa [#allocation3 + $0x1], 1 }
 0x161   :  { %608 = vsyncpa [#allocation4], 1 }
 0x162   :  { %610 = vsyncpa [#allocation4 + $0x1], 1 }
 0x163   :  { %611 = vsyncpa [#allocation7], 1 }
 0x164   :  { %613 = vsyncpa [#allocation7 + $0x1], 1 }

// kernel: bn_classifier_forward.2
= control target key start
LH: loop header
LB: loop body
LE: loop exit
PB: predicated region body
PF: predicated region fallthrough
CT: control target
= control target key end

     0   :  { %s1097_s0 = inlined_call_operand.hbm [shape: f32[37,256], index: 0, kind: input, shape index: {}]   ;;  %s1098_s1 = inlined_call_operand.hbm [shape: f32[1,256], index: 1, kind: input, shape index: {}]   ;;  %s1099_s2 = inlined_call_operand.hbm [shape: f32[1,256], index: 2, kind: input, shape index: {}]   ;;  %s1100_s3 = inlined_call_operand.vmem [shape: f32[1,256], index: 3, kind: output, shape index: {0}]   ;;  %s1101_s4 = inlined_call_operand.vmem [shape: f32[1,256], index: 4, kind: output, shape index: {1}]  }
   0x1   :  { %1112 = sst [smem:[#allocation17_spill]] %s1098_s1 }
   0x2   :  { %1113 = sst [smem:[#allocation18_spill]] %s1100_s3 }
   0x3   :  { %1114 = sst [smem:[#allocation19_spill]] %s1101_s4 }
   0x4   :  { %10 = vsyncpa [#allocation6], 0 }
   0x5   :  { %12 = vsyncpa [#allocation6 + $0x1], 0 }
   0x6   :  { %13 = vsyncpa [#allocation8], 0 }
   0x7   :  { %15 = vsyncpa [#allocation8 + $0x1], 0  ;;  %s833_s15 = smov 0   ;;  %s835_s16 = smov 0  }
   0x8   :  { %s837_s17 = smov 0   ;;  %s839_s18 = smov 0  }
   0x9   :  { %s841_s19 = smov 0   ;;  %s843_s20 = smov 0  }
   0xa   :  { %s845_s21 = smov 0   ;;  %s847_s22 = smov 0  }
   0xb   :  { %s849_s23 = smov 0   ;;  %s851_s24 = smov 0  }
   0xc   :  { %s853_s25 = smov 0  }
   0xd LB: > { %1115 = sst [smem:[#allocation12_spill]] %s766_s16  ;;  %s1102_s26 = sadd.s32 4294967295, %s802_s25   ;;  %s802_s25 = sphi %s853_s25, %s21_s25   ;;  %s798_s24 = sphi %s851_s24, %s1154_s24   ;;  %s794_s23 = sphi %s849_s23, %s1153_s23   ;;  %s790_s22 = sphi %s847_s22, %s1152_s22   ;;  %s786_s21 = sphi %s845_s21, %s1151_s21   ;;  %s782_s20 = sphi %s843_s20, %s1150_s20   ;;  %s778_s19 = sphi %s841_s19, %s1149_s19   ;;  %s774_s18 = sphi %s839_s18, %s1148_s18   ;;  %s770_s17 = sphi %s837_s17, %s1147_s17   ;;  %s766_s16 = sphi %s835_s16, %s1146_s16   ;;  %s762_s15 = sphi %s833_s15, %s1145_s15  }
   0xe   : > { %1116 = sst [smem:[#allocation13_spill]] %s786_s21  ;;  %p50_p0 = scmp.eq.s32.totalorder %s802_s25, 0 }
   0xf   : > { %1117 = sst [smem:[#allocation14_spill]] %s790_s22  ;;  %p890_p1 = scmp.eq.s32.totalorder %s1102_s26, 0 }
  0x10   : > { %s33_s28 = sadd.s32 1, %s798_s24  ;;  %p75_p2 = scmp.ne.s32.totalorder %s770_s17, %s766_s16 }
  0x11   : > { %p81_p3 = scmp.ne.s32.totalorder %s766_s16, %s762_s15  ;;  %p532_p5 = scmp.lt.s32.totalorder %s802_s25, 10 }
  0x12   : > { %p77_p4 = por %p75_p2, %p50_p0  ;;  %s203_s30 = sand.u32 1, %s802_s25  }
  0x13   : > { %p903_p6 = por %p81_p3, %p890_p1  ;;  %s1103_s5 = sand.u32 1, %s770_s17  }
  0x14   : > { %s1104_s6 = sshll.u32 %s798_s24, 4  ;;  %s1121_s1 = sld [smem:[#allocation17_spill]] }
  0x15   : > { %s1119_s29 = scalar_select %p903_p6, 1, 0 }
  0x16   : > { %s206_s10 = scalar_lea.vmem [#allocation7], %s1103_s5  ;;  %p919_p7 = pnand %p532_p5, %p77_p4 }
  0x17   : > { %1120 = sst [smem:[#allocation15_spill]] %s1119_s29  ;;  %s213_s11 = sshll.u32 %s206_s10, 4  ;;  %s214_s11 = int_to_ptr.vmem [resolvable:$true] %s213_s11 }
  0x18   : > { %p508_p8 = scmp.ge.s32.totalorder %s802_s25, 1  ;;  %s925_s14 = scalar_lea.sflag [#allocation8], %s203_s30 }
  0x19   : > { %p1111_p9 = pneg %p919_p7  ;;  %s637_s15 = scalar_lea.vmem %s214_s11, 16 }
  0x1a   : > { %s211_s9 = scalar_lea.hbm %s1121_s1, %s1104_s6  ;;  %p638_p10 = scmp.ne.s32.totalorder %s214_s11, %s637_s15 }
  0x1b   : > { %s804_s7 = smov [#allocation7]  }
  0x1c   : > { %p640_p11 = pnand %p638_p10, %p1111_p9  ;;  %s642_s8 = sshll.u32 %s804_s7, 4  ;;  %s643_s8 = int_to_ptr.vmem [resolvable:$false] %s642_s8 }
  0x1d   : > { %s644_s10 = scalar_lea.vmem %s643_s8, 32  ;;  %p645_p13 = scmp.lt.s32.totalorder %s214_s11, %s643_s8 }
  0x1e   : > { %p641_p12 = pneg %p640_p11  ;;  %p646_p2 = scmp.lt.s32.totalorder %s644_s10, %s637_s15 }
  0x20   : > { %p647_p3 = por %p646_p2, %p645_p13 }
  0x22   : > { %p648_p4 = pnand %p647_p3, %p641_p12 }
  0x24   : > { %651 = shalt.err (!%p648_p4)
}
  0x25   : > { %528 = dma.hbm_to_vmem [thread:$0]  (!%p919_p7), %s211_s9, 16, %s214_s11, %s925_s14  }
  0x26   : > { %p235_p10 = scmp.lt.s32.totalorder %s802_s25, 11  ;;  %s30_s15 = sadd.s32 1, %s794_s23 }
  0x27   : > { %s42_s7 = sadd.s32 1, %s782_s20  ;;  %p31_p12 = scmp.ge.s32.totalorder %s30_s15, 5 }
  0x28   : > { %p938_p11 = pnand %p508_p8, %p235_p10  ;;  %p49_p13 = scmp.ne.s32.totalorder %s782_s20, %s778_s19 }
  0x29   : > { %p55_p2 = scmp.ne.s32.totalorder %s778_s19, %s774_s18  ;;  %s183_s8 = sand.u32 1, %s782_s20  }
  0x2a   : > { %s1156_s15 = smov (%p31_p12, %s30_s15), 0  ;;  %s1158_s28 = smov (!%p31_p12, %s33_s28), %s798_s24 }
  0x2b   : > { %1124 = sst [smem:[#allocation16_spill]] %s1156_s15  ;;  %s37_s9 = ssub.s32 %s794_s23, %s1156_s15 }
  0x2c   : > { %p958_p8 = por %p50_p0, %p49_p13  ;;  %p35_p3 = scmp.ge.s32.totalorder %s1158_s28, 2 }
  0x2d   : > { %p964_p4 = por %p890_p1, %p55_p2  ;;  %s503_s18 = sshll.u32 %s183_s8, 3 }
  0x2e   : > { %s1160_s28 = smov (%p35_p3, %s1158_s28), 0  ;;  %s504_s26 = sshll.u32 %s794_s23, 1 }
  0x2f   : > { %s38_s5 = ssub.s32 %s798_s24, %s1160_s28  ;;  %s192_s6 = sadd.s32 %s798_s24, %s504_s26 }
  0x30   : > { %s39_s13 = sor.u32 %s38_s5, %s37_s9  ;;  %p66_p0 = scmp.eq.s32.totalorder %s38_s5, 0 }
  0x31   : > { %p40_p10 = scmp.eq.s32.totalorder %s39_s13, 0  ;;  %s505_s1 = sshll.u32 %s192_s6, 7 }
  0x32   : > { %s1127_s27 = sadd.s32 1, %s770_s17  ;;  %s194_s22 = scalar_lea.hbm %s1097_s0, %s505_s1 }
  0x33   : > { %s977_s15 = scalar_select %p66_p0, %s770_s17, %s1127_s27  }
  0x34   : > { %s980_s21 = scalar_select %p40_p10, %s782_s20, %s42_s7  }
  0x35   : > { %s187_s29 = scalar_lea.vmem [#allocation5], %s503_s18  ;;  %p989_p1 = pnand %p532_p5, %p958_p8 }
  0x36   : > { %s196_s16 = sshll.u32 %s187_s29, 4  ;;  %s1129_s5 = sshll.u32 %s798_s24, 4  ;;  %s197_s16 = int_to_ptr.vmem [resolvable:$true] %s196_s16 }
  0x37   : > { %s998_s7 = scalar_lea.hbm %s1099_s2, %s1129_s5  ;;  %s1130_s9 = sand.u32 1, %s770_s17  }
  0x38   : > { %s223_s27 = scalar_lea.vmem [#allocation9], %s1130_s9  ;;  %s184_s1 = scalar_lea.sflag [#allocation6], %s183_s8 }
  0x39   : > { %s230_s3 = sshll.u32 %s223_s27, 4  ;;  %p654_p12 = pneg %p989_p1  ;;  %s1002_s3 = int_to_ptr.vmem [resolvable:$true] %s230_s3 }
  0x3a   : > { %s665_s4 = scalar_lea.vmem %s197_s16, 128  ;;  %s805_s29 = smov [#allocation5]  }
  0x3b   : > { %p666_p5 = scmp.ne.s32.totalorder %s197_s16, %s665_s4  ;;  %s670_s11 = sshll.u32 %s805_s29, 4  ;;  %s671_s11 = int_to_ptr.vmem [resolvable:$false] %s670_s11 }
  0x3c   : > { %s672_s18 = scalar_lea.vmem %s671_s11, 256  ;;  %p673_p8 = scmp.lt.s32.totalorder %s197_s16, %s671_s11 }
  0x3d   : > { %p668_p13 = pnand %p666_p5, %p654_p12  ;;  %p674_p3 = scmp.lt.s32.totalorder %s672_s18, %s665_s4 }
  0x3f   : > { %p669_p2 = pneg %p668_p13  ;;  %p675_p0 = por %p674_p3, %p673_p8 }
  0x41   : > { %p676_p10 = pnand %p675_p0, %p669_p2 }
  0x43   : > { %679 = shalt.err (!%p676_p10)
}
  0x44   : > { %525 = dma.hbm_to_vmem [thread:$0]  (!%p989_p1), %s194_s22, 128, %s197_s16, %s184_s1  }
  0x45   : > { %s693_s8 = scalar_lea.vmem %s1002_s3, 16  ;;  %p1131_p12 = pneg %p919_p7 }
  0x46   : > { %p694_p9 = scmp.ne.s32.totalorder %s1002_s3, %s693_s8  ;;  %s806_s5 = smov [#allocation9]  }
  0x47   : > { %s698_s6 = sshll.u32 %s806_s5, 4  ;;  %s699_s6 = int_to_ptr.vmem [resolvable:$false] %s698_s6 }
  0x48   : > { %p696_p5 = pnand %p694_p9, %p1131_p12  ;;  %s700_s13 = scalar_lea.vmem %s699_s6, 32 }
  0x49   : > { %p701_p8 = scmp.lt.s32.totalorder %s1002_s3, %s699_s6  ;;  %p702_p2 = scmp.lt.s32.totalorder %s700_s13, %s693_s8 }
  0x4a   : > { %p697_p13 = pneg %p696_p5 }
  0x4b   : > { %p703_p3 = por %p702_p2, %p701_p8 }
  0x4d   : > { %p704_p0 = pnand %p703_p3, %p697_p13 }
  0x4f   : > { %707 = shalt.err (!%p704_p0)
}
  0x50   : > { %531 = dma.hbm_to_vmem [thread:$0]  (!%p919_p7), %s998_s7, 16, %s1002_s3, %s925_s14  }
  0x51   : > { %239 = sbr.rel (%p938_p11) target bundleno = 178 (0xb2), region = 32  ;;  %s241_s16 = sand.u32 (!%p938_p11), 1, %s778_s19  }
  0x52   : > { %s509_s22 = sshll.u32 (!%p938_p11), %s241_s16, 3  ;;  %s242_s26 = scalar_lea.sflag (!%p938_p11), [#allocation6], %s241_s16 }
  0x53   : > { %s245_s9 = scalar_lea.vmem (!%p938_p11), [#allocation5], %s509_s22 }
  0x56   : > { %753 = dma.done.wait (%p964_p4), %s242_s26, 128  }
  0x57   : > { %755 = vsyncadd (%p964_p4), %s242_s26, 4294967168  ;;  %s1132_s12 = sadd.s32 4294967295, %s802_s25   ;;  %s1133_s27 = sld [smem:[#allocation12_spill]] }
  0x58   : > { %s250_s4 = sand.u32 1, %s1132_s12  }
  0x59   : > { %s251_s7 = scalar_lea.sflag [#allocation8], %s250_s4 }
  0x5d   : > { %s252_s14 = sand.u32 1, %s1133_s27  }
  0x5e   : > { %s1029_s30 = scalar_lea.vmem [#allocation7], %s252_s14 }
  0x5f   : > { %757 = dma.done.wait (%p903_p6), %s251_s7, 32  }
  0x60   : > { %759 = vsyncadd (%p903_p6), %s251_s7, 4294967264  ;;  %s1135_s3 = sld [smem:[#allocation14_spill]]  ;;  %s1047_s16 = scalar_lea.vmem [#allocation9], %s252_s14 }
  0x61   : > { %s1136_s11 = sld [smem:[#allocation18_spill]] }
  0x62   : > { %s1137_s6 = sld [smem:[#allocation19_spill]] }
  0x63   : > { %s1138_s22 = sld [smem:[#allocation13_spill]] }
  0x66   : > { %p295_p7 = scmp.lt.s32.totalorder %s1135_s3, 1 }
  0x68   : > { %s1162_s3 = smov (!%p295_p7, %s1135_s3), 1 }
  0x69   : > { %s297_s18 = scalar_lea.vmem %s1136_s11, %s1162_s3  ;;  %s300_s13 = scalar_lea.vmem %s1137_s6, %s1162_s3 }
  0x6a   : > { %p510_p9 = scmp.ne.s32.totalorder %s1138_s22, 0 }
  0x6c   : > { %304 = sbr.rel (%p510_p9) target bundleno = 116 (0x74), region = 48 }
  0x71   : > { %v305_v0 = vld [vmem:[%s245_s9] sm:$0x1]  ;;  %v807_v1 = vmov 0.0  }
  0x72   : > { %306 = vst [vmem:[#allocation2] sm:$0x1] %v305_v0  ;;  %307 = vst [vmem:[#allocation3] sm:$0x1] %v807_v1 }
  0x73   : > { %308 = vst [vmem:[#allocation4] sm:$0x1] %v807_v1 }
  0x74 PF: > { %s1139_s26 = sld [smem:[#allocation13_spill]]  ;;  %v311_v2 = vlaneseq  ;;  %v315_v3 = vld [vmem:[%s245_s9] sm:$0xff] }
  0x76   : > { %v312_v6 = vshrl.u32 %v311_v2, 7 }
  0x79   : > { %v512_v4 = vld [vmem:[#allocation2] ss:$0 sm:$0xff]  ;;  %v325_v19 = vld [vmem:[#allocation3] sm:$0x1] }
  0x7a   : > { %s511_s12 = sshll.u32 %s1139_s26, 3  ;;  %v323_v5 = vsub.f32 %v315_v3, %v512_v4  ;;  %v334_v22 = vld [vmem:[#allocation4] sm:$0x1]  ;;  %p513_p6 = scmp.ne.s32.totalorder %s1139_s26, 4 }
  0x7b   : > { %s310_s27 = ssub.s32 37, %s511_s12 }
  0x7c   : > { %v313_v7 = vstv %s310_s27 }
  0x7d   : > { %vm314_vm0 = vcmp.lt.s32.totalorder %v312_v6, %v313_v7 }
  0x7e   : > { %v324_v8 = vsel %vm314_vm0, %v323_v5, 0.0 }
  0x7f   : > { %v326_v9 = vrot.slane %v324_v8, 4  ;;  %v335_v10 = vmul.f32 %v324_v8, %v324_v8 }
  0x81   : > { %v327_v11 = vadd.f32 %v326_v9, %v324_v8  ;;  %v336_v12 = vrot.slane %v335_v10, 4 }
  0x83   : > { %v328_v13 = vrot.slane %v327_v11, 2  ;;  %v337_v14 = vadd.f32 %v336_v12, %v335_v10 }
  0x85   : > { %v329_v15 = vadd.f32 %v328_v13, %v327_v11  ;;  %v338_v16 = vrot.slane %v337_v14, 2 }
  0x87   : > { %v330_v17 = vrot.slane %v329_v15, 1  ;;  %v339_v18 = vadd.f32 %v338_v16, %v337_v14 }
  0x89   : > { %v331_v20 = vadd.f32 %v330_v17, %v329_v15  ;;  %v340_v21 = vrot.slane %v339_v18, 1 }
  0x8b   : > { %v332_v23 = vadd.f32 %v331_v20, %v325_v19  ;;  %v341_v24 = vadd.f32 %v340_v21, %v339_v18  ;;  %347 = sbr.rel (%p513_p6) target bundleno = 178 (0xb2), region = 52 }
  0x8d   : > { %333 = vst [vmem:[#allocation3] sm:$0x1] %v332_v23  ;;  %v342_v25 = vadd.f32 %v341_v24, %v334_v22 }
  0x8f   : > { %343 = vst [vmem:[#allocation4] sm:$0x1] %v342_v25 }
  0x90   : > { %v350_v33 = vld [vmem:[#allocation2] sm:$0x1] }
  0x91   : > { %v358_v34 = vld [vmem:[%s1029_s30] sm:$0x1] }
  0x92   : > { %v361_v38 = vld [vmem:[%s1047_s16] sm:$0x1] }
  0x94   : > { %v348_v26 = vld [vmem:[#allocation3] sm:$0x1] }
  0x95   : > { %v349_v28 = vmul.f32 0.027027028, %v348_v26 }
  0x96   : > { %v352_v27 = vld [vmem:[#allocation4] sm:$0x1] }
  0x97   : > { %v353_v29 = vmul.f32 0.027027028, %v352_v27  ;;  %v354_v30 = vmul.f32 %v349_v28, %v349_v28  ;;  %v351_v35 = vadd.f32 %v350_v33, %v349_v28 }
  0x99   : > { %v355_v31 = vsub.f32 %v353_v29, %v354_v30 }
  0x9b   : > { %v356_v32 = vadd.f32 1e-05, %v355_v31 }
  0x9d   : > { %622 = vrsqrt.f32 %v356_v32 }
  0xaa   : > { %v623_v36 = vpop.eup %622 }
  0xab   : > { %v359_v37 = vmul.f32 %v623_v36, %v358_v34 }
  0xad   : > { %360 = vst [vmem:[%s297_s18] sm:$0x1] %v359_v37  ;;  %v362_v39 = vmul.f32 %v359_v37, %v351_v35 }
  0xaf   : > { %v363_v40 = vsub.f32 %v361_v38, %v362_v39 }
  0xb1   : > { %364 = vst [vmem:[%s300_s13] sm:$0x1] %v363_v40 }
  0xb2 PF: > { %s21_s25 = sadd.s32 1, %s802_s25   ;;  %s1142_s30 = sld [smem:[#allocation12_spill]] }
  0xb3   : > { %p18_p11 = scmp.ge.s32.totalorder %s21_s25, 12   ;;  %s1143_s29 = smov %s977_s15 }
  0xb4   : > { %s1144_s11 = sld [smem:[#allocation16_spill]]  ;;  %s1146_s16 = smov %s770_s17 }
  0xb5   : > { %s1147_s17 = smov %s1143_s29  ;;  %s1148_s18 = smov %s778_s19 }
  0xb6   : > { %s1149_s19 = smov %s782_s20  ;;  %s1150_s20 = smov %s980_s21 }
  0xb7   : > { %s1151_s21 = smov %s794_s23  ;;  %s1152_s22 = smov %s798_s24 }
  0xb8   : > { %s1145_s15 = smov %s1142_s30  ;;  %s1154_s24 = smov %s1160_s28 }
  0xb9   :  { %20 = sbr.rel (!%p18_p11) target bundleno = 13 (0xd), region = 116 }
  0xba   : > { %s1153_s23 = smov %s1144_s11 }
  0xbe   :  { %394 = vsyncpa [#allocation6], 1 }
  0xbf   :  { %396 = vsyncpa [#allocation6 + $0x1], 1 }
  0xc0   :  { %397 = vsyncpa [#allocation8], 1 }
  0xc1   :  { %399 = vsyncpa [#allocation8 + $0x1], 1 }

</bundles_post_ra>
